<compile_context>
chip_gen: v5e
topology: v5e:2x2
jax: 0.10.0
libtpu: 0.0.40
codegen_flags: <defaults>
</compile_context>

<pallas_src>
import functools
import math

import jax
import jax.numpy as jnp
from jax.experimental import pallas as pl
from jax.experimental.pallas import tpu as pltpu

_LANES = 128
_MAX_TILE_ROWS = 2048     # 2048*128*4B = 1 MiB f32 input / grid step
_MIN_SPLIT_ROWS = 1024    # above this, force >= 2 grid steps (v7x megacore)


def _round_up(n, m):
    return ((n + m - 1) // m) * m


def _binary_entropy_clamped(p, eps=1e-20):
    return (-p * jnp.log(jnp.maximum(p, eps))
            - (1.0 - p) * jnp.log(jnp.maximum(1.0 - p, eps)))


def _lfqy_kernel(x_ref, z_ref, idx_ref, *part_refs,
                 dim, tile_rows, total_elems, has_tail, scale, compute_entropy):
    """One grid step over a lane-dense (tile_rows, 128) slab of codes."""
    cpr = _LANES // dim                       # codes per lane-dense row
    x = x_ref[...].astype(jnp.float32)        # in-kernel upcast (input stays bf16/f32 in HBM)

    # Straight-through forward value: sign(x) (0 at exactly 0, like torch.sign).
    z = jnp.where(x > 0.0, 1.0, jnp.where(x < 0.0, -1.0, 0.0))
    z_ref[...] = z.astype(z_ref.dtype)

    # Constant grouping matrix, built in-kernel (no extra input stream / DMA):
    #   gmat[l, c] = 2^(l - c*dim)  if c*dim <= l < (c+1)*dim  else 0
    lane_i = jax.lax.broadcasted_iota(jnp.int32, (_LANES, cpr), 0)
    code_i = jax.lax.broadcasted_iota(jnp.int32, (_LANES, cpr), 1)
    in_code = (lane_i >= code_i * dim) & (lane_i < (code_i + 1) * dim)
    bitpos = lane_i - code_i * dim
    gmat = jnp.zeros((_LANES, cpr), jnp.float32)
    for d in range(dim):                       # dim <= 16, fully unrolled, ~2 vregs of work
        gmat = jnp.where(in_code & (bitpos == d), float(2 ** d), gmat)
    gmat = gmat.astype(jnp.bfloat16)

    # Bits -> decimal via a tiny single-pass bf16 MXU matmul (exact for dim <= 16).
    bits = jnp.where(x > 0.0, 1.0, 0.0).astype(jnp.bfloat16)
    idx_f = jnp.dot(bits, gmat, preferred_element_type=jnp.float32)
    idx_ref[...] = idx_f.astype(jnp.int32)

    if compute_entropy:
        part_ref, = part_refs
        a = x * scale if scale != 1.0 else x
        # Shared-exp sigmoid + closed-form entropy: H(sigmoid(a)) = softplus(a) - a*sigmoid(a)
        ea = jnp.exp(-jnp.abs(a))
        inv = 1.0 / (1.0 + ea)
        p = jnp.where(a >= 0.0, 1.0, ea) * inv                # sigmoid(a)
        h = jnp.maximum(a, 0.0) + jnp.log(1.0 + ea) - a * p   # binary entropy
        if has_tail:
            # Mask elements beyond the real data (partial edge block rows contain
            # unspecified data; a ragged last row contains zero padding).
            row_i = jax.lax.broadcasted_iota(jnp.int32, x.shape, 0)
            lane2 = jax.lax.broadcasted_iota(jnp.int32, x.shape, 1)
            g = (pl.program_id(0) * tile_rows + row_i) * _LANES + lane2
            valid = g < total_elems
            p = jnp.where(valid, p, 0.0)
            h = jnp.where(valid, h, 0.0)
        # One merged per-tile partial-sum output: row 0 = entropy sums, row 1 = prob sums.
        part = jnp.concatenate([jnp.sum(h, axis=0, keepdims=True),
                                jnp.sum(p, axis=0, keepdims=True)], axis=0)
        part_ref[...] = part.reshape(1, 2, _LANES)


def lfqy_forward(x, *, inv_temperature=1.0, training=True,
                 entropy_loss_weight=0.1, diversity_gamma=1.0,
                 max_tile_rows=None):
    """x: (..., D) float. Returns (z, entropy_aux_loss, indices) like LFQY.forward."""
    orig_shape = x.shape
    orig_dtype = x.dtype
    D = orig_shape[-1]
    if _LANES % D != 0:
        # TODO(synk): support dim that does not divide 128 (needs a different packing).
        raise NotImplementedError("lfqy_forward requires dim to divide 128")
    if D > 16:
        # left-shift / f32-accumulation exactness bounds; 2^16 codebook max here.
        raise NotImplementedError("lfqy_forward index path supports dim <= 16")
    cpr = _LANES // D
    M = int(math.prod(orig_shape[:-1])) if orig_shape[:-1] else 1
    total = M * D
    rows = pl.cdiv(total, _LANES)
    exact = (total % _LANES == 0)

    if exact:
        xd = x.reshape(rows, _LANES)                 # free view, no copy
    else:
        # Ragged tail (< 128 elements): pad the last lane-row with zeros.
        # (Zeros are inert: bits=0, and the tail is masked in-kernel for entropy.)
        pad = rows * _LANES - total
        flat = jnp.concatenate([x.reshape(-1), jnp.zeros((pad,), orig_dtype)])
        xd = flat.reshape(rows, _LANES)

    cap = _MAX_TILE_ROWS if max_tile_rows is None else int(max_tile_rows)
    tile_rows = min(cap, _round_up(rows, 8))
    if rows > _MIN_SPLIT_ROWS and tile_rows >= rows:
        # Keep >= 2 grid steps so the parallel axis can use both TCs on v7x.
        tile_rows = _round_up(pl.cdiv(rows, 2), 8)
    num_tiles = pl.cdiv(rows, tile_rows)
    has_tail = (num_tiles * tile_rows * _LANES != total)

    kernel = functools.partial(
        _lfqy_kernel,
        dim=D,
        tile_rows=tile_rows,
        total_elems=total,
        has_tail=bool(has_tail),
        scale=float(1.0 / float(inv_temperature)),
        compute_entropy=bool(training),
    )

    in_specs = [pl.BlockSpec((tile_rows, _LANES), lambda i: (i, 0))]      # x slab
    out_specs = [
        pl.BlockSpec((tile_rows, _LANES), lambda i: (i, 0)),              # z slab (lane-dense)
        pl.BlockSpec((tile_rows, cpr), lambda i: (i, 0)),                 # indices slab
    ]
    out_shape = [
        jax.ShapeDtypeStruct((rows, _LANES), orig_dtype),
        jax.ShapeDtypeStruct((rows, cpr), jnp.int32),
    ]
    if training:
        out_specs.append(pl.BlockSpec((1, 2, _LANES), lambda i: (i, 0, 0)))
        out_shape.append(jax.ShapeDtypeStruct((num_tiles, 2, _LANES), jnp.float32))

    results = pl.pallas_call(
        kernel,
        grid=(num_tiles,),
        in_specs=in_specs,
        out_specs=tuple(out_specs),
        out_shape=tuple(out_shape),
        compiler_params=pltpu.CompilerParams(
            dimension_semantics=("parallel",)),
    )(xd)

    if exact:
        z = results[0].reshape(orig_shape)                    # free reshape, no copy
        indices = results[1].reshape(orig_shape[:-1])
    else:
        z = results[0].reshape(-1)[:total].reshape(orig_shape)
        indices = results[1].reshape(-1)[:M].reshape(orig_shape[:-1])

    if training:
        part = results[2]                                     # (num_tiles, 2, 128)
        bit_entropy = jnp.sum(part[:, 0, :]) / M
        lane_prob_sum = jnp.sum(part[:, 1, :], axis=0)        # (128,)
        avg_prob = lane_prob_sum.reshape(cpr, D).sum(axis=0) / M
        codebook_entropy = jnp.sum(_binary_entropy_clamped(avg_prob))
        entropy_aux_loss = ((bit_entropy - diversity_gamma * codebook_entropy)
                            * entropy_loss_weight)
    else:
        # Matches torch eval branch: zeros(1) * weight (shape (1,)).
        entropy_aux_loss = jnp.zeros((1,), dtype=z.dtype)
    return z, entropy_aux_loss, indices


def _lfqy_reference(x, *, inv_temperature=1.0, training=True,
                    entropy_loss_weight=0.1, diversity_gamma=1.0):
    """Pure-JAX reference mirroring the PyTorch forward."""
    z = jnp.sign(x)
    mask = 2 ** jnp.arange(x.shape[-1])
    indices = jnp.sum((z > 0).astype(jnp.int32) * mask, axis=-1)
    if training:
        prob = jax.nn.sigmoid(x / inv_temperature)
        bit_entropy = jnp.mean(jnp.sum(_binary_entropy_clamped(prob), axis=-1))
        avg_prob = jnp.mean(prob.reshape(-1, x.shape[-1]), axis=0)
        codebook_entropy = jnp.sum(_binary_entropy_clamped(avg_prob))
        loss = (bit_entropy - diversity_gamma * codebook_entropy) * entropy_loss_weight
    else:
        loss = jnp.zeros((1,), x.dtype)
    return z, loss, indices


if __name__ == "__main__":
    key = jax.random.PRNGKey(0)
    k1, k2, k3, k4 = jax.random.split(key, 4)

    # 1) small (b, n, d) with exact lane packing -> no padding / no output slice
    x1 = jax.random.normal(k1, (2, 64, 8), dtype=jnp.float32)
    z1, l1, i1 = lfqy_forward(x1, training=True)
    jax.block_until_ready((z1, l1, i1))
    z1r, l1r, i1r = _lfqy_reference(x1, training=True)
    assert jnp.allclose(z1, z1r), "z mismatch (small)"
    assert jnp.allclose(l1, l1r, atol=1e-5), "loss mismatch (small)"
    assert jnp.array_equal(i1, i1r), "indices mismatch (small)"

    # 2) multi-tile grid with a partial edge block (forced small tile) + temperature
    x2 = jax.random.normal(k2, (2, 4000, 8), dtype=jnp.float32)
    z2, l2, i2 = lfqy_forward(x2, inv_temperature=0.5, training=True, max_tile_rows=64)
    jax.block_until_ready((z2, l2, i2))
    z2r, l2r, i2r = _lfqy_reference(x2, inv_temperature=0.5, training=True)
    assert jnp.allclose(z2, z2r), "z mismatch (multi-tile)"
    assert jnp.allclose(l2, l2r, atol=1e-5, rtol=1e-4), "loss mismatch (multi-tile)"
    assert jnp.array_equal(i2, i2r), "indices mismatch (multi-tile)"

    # 3) ragged code count (lane-tail padding) + eval mode (entropy work skipped)
    x3 = jax.random.normal(k3, (1, 10, 8), dtype=jnp.float32)
    z3t, l3t, i3t = lfqy_forward(x3, training=True)
    z3e, l3e, i3e = lfqy_forward(x3, training=False)
    jax.block_until_ready((z3t, l3t, i3t, z3e, l3e, i3e))
    z3r, l3r, i3r = _lfqy_reference(x3, training=True)
    assert jnp.allclose(z3t, z3r), "z mismatch (ragged)"
    assert jnp.allclose(l3t, l3r, atol=1e-5), "loss mismatch (ragged)"
    assert jnp.array_equal(i3t, i3r), "indices mismatch (ragged)"
    assert jnp.allclose(z3e, z3r) and jnp.array_equal(i3e, i3r), "eval mismatch"
    assert l3e.shape == (1,) and float(l3e[0]) == 0.0, "eval loss mismatch"

    # 4) bf16 input (exercises the in-kernel upcast; HBM read stays 2 B/elem)
    x4 = jax.random.normal(k4, (2, 64, 8), dtype=jnp.bfloat16)
    z4, l4, i4 = lfqy_forward(x4, training=True)
    jax.block_until_ready((z4, l4, i4))
    z4r, l4r, i4r = _lfqy_reference(x4.astype(jnp.float32), training=True)
    assert jnp.allclose(z4.astype(jnp.float32), z4r), "z mismatch (bf16)"
    assert jnp.allclose(l4, l4r, atol=1e-5), "loss mismatch (bf16)"
    assert jnp.array_equal(i4, i4r), "indices mismatch (bf16)"

    print("KERNEL_OK")
</pallas_src>

<mosaic_0001>
module attributes {stable_mosaic.version = 11 : i64} {
  func.func @_lfqy_kernel(%arg0: i32, %arg1: memref<8x128xf32, #tpu.memory_space<vmem>>, %arg2: memref<8x128xf32, #tpu.memory_space<vmem>>, %arg3: memref<8x16xi32, #tpu.memory_space<vmem>>, %arg4: memref<1x2x128xf32, #tpu.memory_space<vmem>>) attributes {dimension_semantics = [#tpu.dimension_semantics<parallel>], iteration_bounds = array<i64: 1>, scalar_prefetch = 0 : i64, scratch_operands = 0 : i64, tpu.core_type = #tpu.core_type<tc>, window_params = [{transform_indices = @transform_0, window_bounds = array<i64: 8, 128>}, {transform_indices = @transform_1, window_bounds = array<i64: 8, 128>}, {transform_indices = @transform_2, window_bounds = array<i64: 8, 16>}, {transform_indices = @transform_3, window_bounds = array<i64: 1, 2, 128>}]} {
    %c0 = arith.constant 0 : index
    %c0_0 = arith.constant 0 : index
    %0 = vector.load %arg1[%c0, %c0_0] : memref<8x128xf32, #tpu.memory_space<vmem>>, vector<8x128xf32>
    %cst = arith.constant 0.000000e+00 : f32
    %1 = vector.broadcast %cst : f32 to vector<8x128xf32>
    %2 = arith.cmpf ogt, %0, %1 : vector<8x128xf32>
    %cst_1 = arith.constant 0.000000e+00 : f32
    %3 = vector.broadcast %cst_1 : f32 to vector<8x128xf32>
    %4 = arith.cmpf olt, %0, %3 : vector<8x128xf32>
    %cst_2 = arith.constant -1.000000e+00 : f32
    %cst_3 = arith.constant 0.000000e+00 : f32
    %5 = vector.broadcast %cst_2 : f32 to vector<8x128xf32>
    %6 = vector.broadcast %cst_3 : f32 to vector<8x128xf32>
    %7 = arith.select %4, %5, %6 : vector<8x128xi1>, vector<8x128xf32>
    %cst_4 = arith.constant 1.000000e+00 : f32
    %8 = vector.broadcast %cst_4 : f32 to vector<8x128xf32>
    %9 = arith.select %2, %8, %7 : vector<8x128xi1>, vector<8x128xf32>
    %c0_5 = arith.constant 0 : index
    %c0_6 = arith.constant 0 : index
    %10 = vector.load %arg2[%c0_5, %c0_6] : memref<8x128xf32, #tpu.memory_space<vmem>>, vector<8x128xf32>
    tpu.vector_store %arg2[%c0_5, %c0_6], %9 {strides = array<i32>} : memref<8x128xf32, #tpu.memory_space<vmem>>, vector<8x128xf32>,
    %11 = tpu.iota {dimensions = array<i32: 0>} : vector<128x16xi32>
    %12 = tpu.iota {dimensions = array<i32: 1>} : vector<128x16xi32>
    %c8_i32 = arith.constant 8 : i32
    %13 = vector.broadcast %c8_i32 : i32 to vector<128x16xi32>
    %14 = arith.muli %12, %13 : vector<128x16xi32>
    %15 = arith.cmpi sge, %11, %14 : vector<128x16xi32>
    %c1_i32 = arith.constant 1 : i32
    %16 = vector.broadcast %c1_i32 : i32 to vector<128x16xi32>
    %17 = arith.addi %12, %16 : vector<128x16xi32>
    %c8_i32_7 = arith.constant 8 : i32
    %18 = vector.broadcast %c8_i32_7 : i32 to vector<128x16xi32>
    %19 = arith.muli %17, %18 : vector<128x16xi32>
    %20 = arith.cmpi slt, %11, %19 : vector<128x16xi32>
    %21 = arith.andi %15, %20 : vector<128x16xi1>
    %c8_i32_8 = arith.constant 8 : i32
    %22 = vector.broadcast %c8_i32_8 : i32 to vector<128x16xi32>
    %23 = arith.muli %12, %22 : vector<128x16xi32>
    %24 = arith.subi %11, %23 : vector<128x16xi32>
    %cst_9 = arith.constant 0.000000e+00 : f32
    %25 = vector.broadcast %cst_9 : f32 to vector<128x16xf32>
    %c0_i32 = arith.constant 0 : i32
    %26 = vector.broadcast %c0_i32 : i32 to vector<128x16xi32>
    %27 = arith.cmpi eq, %24, %26 : vector<128x16xi32>
    %28 = arith.andi %21, %27 : vector<128x16xi1>
    %cst_10 = arith.constant 1.000000e+00 : f32
    %29 = vector.broadcast %cst_10 : f32 to vector<128x16xf32>
    %30 = arith.select %28, %29, %25 : vector<128x16xi1>, vector<128x16xf32>
    %c1_i32_11 = arith.constant 1 : i32
    %31 = vector.broadcast %c1_i32_11 : i32 to vector<128x16xi32>
    %32 = arith.cmpi eq, %24, %31 : vector<128x16xi32>
    %33 = arith.andi %21, %32 : vector<128x16xi1>
    %cst_12 = arith.constant 2.000000e+00 : f32
    %34 = vector.broadcast %cst_12 : f32 to vector<128x16xf32>
    %35 = arith.select %33, %34, %30 : vector<128x16xi1>, vector<128x16xf32>
    %c2_i32 = arith.constant 2 : i32
    %36 = vector.broadcast %c2_i32 : i32 to vector<128x16xi32>
    %37 = arith.cmpi eq, %24, %36 : vector<128x16xi32>
    %38 = arith.andi %21, %37 : vector<128x16xi1>
    %cst_13 = arith.constant 4.000000e+00 : f32
    %39 = vector.broadcast %cst_13 : f32 to vector<128x16xf32>
    %40 = arith.select %38, %39, %35 : vector<128x16xi1>, vector<128x16xf32>
    %c3_i32 = arith.constant 3 : i32
    %41 = vector.broadcast %c3_i32 : i32 to vector<128x16xi32>
    %42 = arith.cmpi eq, %24, %41 : vector<128x16xi32>
    %43 = arith.andi %21, %42 : vector<128x16xi1>
    %cst_14 = arith.constant 8.000000e+00 : f32
    %44 = vector.broadcast %cst_14 : f32 to vector<128x16xf32>
    %45 = arith.select %43, %44, %40 : vector<128x16xi1>, vector<128x16xf32>
    %c4_i32 = arith.constant 4 : i32
    %46 = vector.broadcast %c4_i32 : i32 to vector<128x16xi32>
    %47 = arith.cmpi eq, %24, %46 : vector<128x16xi32>
    %48 = arith.andi %21, %47 : vector<128x16xi1>
    %cst_15 = arith.constant 1.600000e+01 : f32
    %49 = vector.broadcast %cst_15 : f32 to vector<128x16xf32>
    %50 = arith.select %48, %49, %45 : vector<128x16xi1>, vector<128x16xf32>
    %c5_i32 = arith.constant 5 : i32
    %51 = vector.broadcast %c5_i32 : i32 to vector<128x16xi32>
    %52 = arith.cmpi eq, %24, %51 : vector<128x16xi32>
    %53 = arith.andi %21, %52 : vector<128x16xi1>
    %cst_16 = arith.constant 3.200000e+01 : f32
    %54 = vector.broadcast %cst_16 : f32 to vector<128x16xf32>
    %55 = arith.select %53, %54, %50 : vector<128x16xi1>, vector<128x16xf32>
    %c6_i32 = arith.constant 6 : i32
    %56 = vector.broadcast %c6_i32 : i32 to vector<128x16xi32>
    %57 = arith.cmpi eq, %24, %56 : vector<128x16xi32>
    %58 = arith.andi %21, %57 : vector<128x16xi1>
    %cst_17 = arith.constant 6.400000e+01 : f32
    %59 = vector.broadcast %cst_17 : f32 to vector<128x16xf32>
    %60 = arith.select %58, %59, %55 : vector<128x16xi1>, vector<128x16xf32>
    %c7_i32 = arith.constant 7 : i32
    %61 = vector.broadcast %c7_i32 : i32 to vector<128x16xi32>
    %62 = arith.cmpi eq, %24, %61 : vector<128x16xi32>
    %63 = arith.andi %21, %62 : vector<128x16xi1>
    %cst_18 = arith.constant 1.280000e+02 : f32
    %64 = vector.broadcast %cst_18 : f32 to vector<128x16xf32>
    %65 = arith.select %63, %64, %60 : vector<128x16xi1>, vector<128x16xf32>
    %66 = arith.truncf %65 : vector<128x16xf32> to vector<128x16xbf16>
    %cst_19 = arith.constant 0.000000e+00 : f32
    %67 = vector.broadcast %cst_19 : f32 to vector<8x128xf32>
    %68 = arith.cmpf ogt, %0, %67 : vector<8x128xf32>
    %cst_20 = arith.constant 1.000000e+00 : f32
    %cst_21 = arith.constant 0.000000e+00 : f32
    %69 = vector.broadcast %cst_20 : f32 to vector<8x128xf32>
    %70 = vector.broadcast %cst_21 : f32 to vector<8x128xf32>
    %71 = arith.select %68, %69, %70 : vector<8x128xi1>, vector<8x128xf32>
    %72 = arith.truncf %71 : vector<8x128xf32> to vector<8x128xbf16>
    %cst_22 = arith.constant dense<0.000000e+00> : vector<8x16xf32>
    %73 = tpu.matmul %72, %66, %cst_22 {dimension_numbers = #tpu.dot_dimension_numbers<[1], [0], [0], [1], [0, 0, 1, 1], [], []>} : vector<8x128xbf16>, vector<128x16xbf16>, vector<8x16xf32> -> vector<8x16xf32>
    %74 = arith.fptosi %73 : vector<8x16xf32> to vector<8x16xi32>
    %c0_23 = arith.constant 0 : index
    %c0_24 = arith.constant 0 : index
    %75 = vector.load %arg3[%c0_23, %c0_24] : memref<8x16xi32, #tpu.memory_space<vmem>>, vector<8x16xi32>
    tpu.vector_store %arg3[%c0_23, %c0_24], %74 {strides = array<i32>} : memref<8x16xi32, #tpu.memory_space<vmem>>, vector<8x16xi32>,
    %76 = math.absf %0 : vector<8x128xf32>
    %cst_25 = arith.constant 0.000000e+00 : f32
    %77 = vector.broadcast %cst_25 : f32 to vector<8x128xf32>
    %78 = arith.subf %77, %76 : vector<8x128xf32>
    %79 = math.exp %78 : vector<8x128xf32>
    %cst_26 = arith.constant 1.000000e+00 : f32
    %80 = vector.broadcast %cst_26 : f32 to vector<8x128xf32>
    %81 = arith.addf %80, %79 : vector<8x128xf32>
    %cst_27 = arith.constant 1.000000e+00 : f32
    %82 = vector.broadcast %cst_27 : f32 to vector<8x128xf32>
    %83 = arith.divf %82, %81 : vector<8x128xf32>
    %cst_28 = arith.constant 0.000000e+00 : f32
    %84 = vector.broadcast %cst_28 : f32 to vector<8x128xf32>
    %85 = arith.cmpf oge, %0, %84 : vector<8x128xf32>
    %cst_29 = arith.constant 1.000000e+00 : f32
    %86 = vector.broadcast %cst_29 : f32 to vector<8x128xf32>
    %87 = arith.select %85, %86, %79 : vector<8x128xi1>, vector<8x128xf32>
    %88 = arith.mulf %87, %83 : vector<8x128xf32>
    %cst_30 = arith.constant 0.000000e+00 : f32
    %89 = vector.broadcast %cst_30 : f32 to vector<8x128xf32>
    %90 = arith.maximumf %0, %89 : vector<8x128xf32>
    %cst_31 = arith.constant 1.000000e+00 : f32
    %91 = vector.broadcast %cst_31 : f32 to vector<8x128xf32>
    %92 = arith.addf %91, %79 : vector<8x128xf32>
    %93 = math.log %92 : vector<8x128xf32>
    %94 = arith.addf %90, %93 : vector<8x128xf32>
    %95 = arith.mulf %0, %88 : vector<8x128xf32>
    %96 = arith.subf %94, %95 : vector<8x128xf32>
    %cst_32 = arith.constant dense<0.000000e+00> : vector<128xf32>
    %97 = vector.multi_reduction <add>, %96, %cst_32 [0] : vector<8x128xf32> to vector<128xf32>
    %98 = vector.shape_cast %97 : vector<128xf32> to vector<1x128xf32>
    %cst_33 = arith.constant dense<0.000000e+00> : vector<128xf32>
    %99 = vector.multi_reduction <add>, %88, %cst_33 [0] : vector<8x128xf32> to vector<128xf32>
    %100 = vector.shape_cast %99 : vector<128xf32> to vector<1x128xf32>
    %101 = tpu.concatenate %98, %100 in 0 : vector<1x128xf32>, vector<1x128xf32> -> vector<2x128xf32>
    %102 = vector.shape_cast %101 : vector<2x128xf32> to vector<1x2x128xf32>
    %c0_34 = arith.constant 0 : index
    %c0_35 = arith.constant 0 : index
    %c0_36 = arith.constant 0 : index
    %103 = vector.load %arg4[%c0_34, %c0_35, %c0_36] : memref<1x2x128xf32, #tpu.memory_space<vmem>>, vector<1x2x128xf32>
    tpu.vector_store %arg4[%c0_34, %c0_35, %c0_36], %102 {strides = array<i32>} : memref<1x2x128xf32, #tpu.memory_space<vmem>>, vector<1x2x128xf32>,
    return
  }
  func.func @transform_0(%arg0: i32) -> (i32, i32) {
    %c0_i32 = arith.constant 0 : i32
    %c0_i32_0 = arith.constant 0 : i32
    return %arg0, %c0_i32 : i32, i32
  }
  func.func @transform_1(%arg0: i32) -> (i32, i32) {
    %c0_i32 = arith.constant 0 : i32
    %c0_i32_0 = arith.constant 0 : i32
    return %arg0, %c0_i32 : i32, i32
  }
  func.func @transform_2(%arg0: i32) -> (i32, i32) {
    %c0_i32 = arith.constant 0 : i32
    %c0_i32_0 = arith.constant 0 : i32
    return %arg0, %c0_i32 : i32, i32
  }
  func.func @transform_3(%arg0: i32) -> (i32, i32, i32) {
    %c0_i32 = arith.constant 0 : i32
    %c0_i32_0 = arith.constant 0 : i32
    %c0_i32_1 = arith.constant 0 : i32
    return %arg0, %c0_i32, %c0_i32_0 : i32, i32, i32
  }
}

</mosaic_0001>

<bundles_post_ra>
// kernel: tpu_custom_call.1
= control target key start
LH: loop header
LB: loop body
LE: loop exit
PB: predicated region body
PF: predicated region fallthrough
CT: control target
= control target key end

     0   :  { %9 = vsyncpa [#allocation3], 0  ;;  %s1332_s0 = inlined_call_operand.hbm [shape: f32[8,128], index: 0, kind: input, shape index: {}]   ;;  %s1333_s1 = inlined_call_operand.hbm [shape: f32[8,128], index: 1, kind: output, shape index: {0}]   ;;  %s1334_s2 = inlined_call_operand.hbm [shape: s32[8,16], index: 2, kind: output, shape index: {1}]   ;;  %s1335_s3 = inlined_call_operand.hbm [shape: f32[1,2,128], index: 3, kind: output, shape index: {2}]  }
   0x1   :  { %10 = vsyncpa [#allocation4], 0 }
   0x2   :  { %11 = vsyncpa [#allocation7], 0  ;;  %s17_s14 = sshll.u32 %s1332_s0, 4  ;;  %s742_s15 = smov [#allocation2]   ;;  %v33_v0 = vlaneseq  ;;  %s18_s14 = int_to_ptr.hbm [resolvable:$true] %s17_s14 }
   0x3   :  { %s19_s16 = sshll.u32 %s742_s15, 4  ;;  %s20_s16 = int_to_ptr.vmem [resolvable:$true] %s19_s16 }
   0x4   :  { %22 = dma.hbm_to_vmem [thread:$0]  %s18_s14, 128, %s20_s16, [#allocation3]  }
   0x5   :  { %736 = dma.done.wait [#allocation3], 128  }
   0x6   :  { %737 = vsyncadd [#allocation3], 4294967168  ;;  %v771_v1 = vshrl.u32 %v33_v0, 7  ;;  %v51_v2 = vand.u32 127, %v33_v0  ;;  %v743_v12 = vmov 0.0   ;;  %s580_s18 = sshll.u32 %s1333_s1, 4  ;;  %s581_s18 = int_to_ptr.hbm [resolvable:$true] %s580_s18 }
   0x7   :  { %s745_s19 = smov [#allocation5]   ;;  %s746_s1 = smov [#allocation6]  }
   0x8   :  { %v48_v3 = vadd.s32 112, %v771_v1  ;;  %v49_v4 = vadd.s32 120, %v771_v1  ;;  %v775_v5 = vmul.u32 8, %v51_v2  ;;  %v69_v6 = vadd.s32 1, %v51_v2  ;;  %s578_s20 = sshll.u32 %s745_s19, 4  ;;  %s589_s21 = sshll.u32 %s746_s1, 4  ;;  %s579_s20 = int_to_ptr.vmem [resolvable:$true] %s578_s20  ;;  %s590_s21 = int_to_ptr.vmem [resolvable:$true] %s589_s21 }
   0x9   :  { %v46_v20 = vadd.s32 96, %v771_v1  ;;  %v47_v22 = vadd.s32 104, %v771_v1  ;;  %v44_v43 = vadd.s32 80, %v771_v1  ;;  %v45_v45 = vadd.s32 88, %v771_v1  ;;  %s591_s24 = sshll.u32 %s1334_s2, 4  ;;  %s747_s25 = smov [#allocation8]   ;;  %s592_s24 = int_to_ptr.hbm [resolvable:$true] %s591_s24 }
   0xa   :  { %vm67_vm0 = vcmp.ge.s32.totalorder %v48_v3, %v775_v5  ;;  %v778_v7 = vmul.u32 8, %v69_v6  ;;  %v117_v8 = vsub.s32 %v48_v3, %v775_v5  ;;  %vm68_vm1 = vcmp.ge.s32.totalorder %v49_v4, %v775_v5  ;;  %s600_s26 = sshll.u32 %s747_s25, 4  ;;  %s602_s29 = sshll.u32 %s1335_s3, 4  ;;  %s601_s26 = int_to_ptr.vmem [resolvable:$true] %s600_s26  ;;  %s603_s29 = int_to_ptr.hbm [resolvable:$true] %s602_s29 }
   0xb   :  { %v118_v9 = vsub.s32 %v49_v4, %v775_v5  ;;  %v822_v26 = vsub.s32 %v46_v20, %v775_v5  ;;  %v827_v28 = vsub.s32 %v47_v22, %v775_v5  ;;  %v891_v49 = vsub.s32 %v44_v43, %v775_v5 }
   0xc   :  { %vm85_vm2 = vcmp.lt.s32.totalorder %v48_v3, %v778_v7  ;;  %vm86_vm3 = vcmp.lt.s32.totalorder %v49_v4, %v778_v7  ;;  %vm133_vm4 = vcmp.eq.s32.totalorder %v117_v8, 0  ;;  %vm181_vm8 = vcmp.eq.s32.totalorder %v117_v8, 1 }
   0xd   :  { %vm785_vm5 = vmand %vm67_vm0, %vm85_vm2  ;;  %vm134_vm6 = vcmp.eq.s32.totalorder %v118_v9, 0  ;;  %vm182_vm10 = vcmp.eq.s32.totalorder %v118_v9, 1  ;;  %vm229_vm12 = vcmp.eq.s32.totalorder %v117_v8, 2  ;;  %vm230_vm14 = vcmp.eq.s32.totalorder %v118_v9, 2 }
   0xe   :  { %vm789_vm7 = vmand %vm68_vm1, %vm86_vm3  ;;  %vm277_vm0 = vcmp.eq.s32.totalorder %v117_v8, 3  ;;  %vm278_vm2 = vcmp.eq.s32.totalorder %v118_v9, 3  ;;  %v897_v51 = vsub.s32 %v45_v45, %v775_v5  ;;  %v42_v3 = vadd.s32 64, %v771_v1 }
   0xf   :  { %vm149_vm9 = vmand %vm785_vm5, %vm133_vm4  ;;  %vm325_vm4 = vcmp.eq.s32.totalorder %v117_v8, 4  ;;  %v43_v6 = vadd.s32 72, %v771_v1 }
  0x10   :  { %vm150_vm11 = vmand %vm789_vm7, %vm134_vm6  ;;  %v165_v13 = vsel %vm149_vm9, 1.0, %v743_v12  ;;  %v961_v11 = vsub.s32 %v42_v3, %v775_v5 }
  0x11   :  { %v166_v14 = vsel %vm150_vm11, 1.0, %v743_v12  ;;  %vm197_vm13 = vmand %vm785_vm5, %vm181_vm8  ;;  %vm326_vm8 = vcmp.eq.s32.totalorder %v118_v9, 4 }
  0x12   :  { %vm198_vm15 = vmand %vm789_vm7, %vm182_vm10  ;;  %v213_v15 = vsel %vm197_vm13, 2.0, %v165_v13  ;;  %vm373_vm10 = vcmp.eq.s32.totalorder %v117_v8, 5 }
  0x13   :  { %v214_v16 = vsel %vm198_vm15, 2.0, %v166_v14  ;;  %vm245_vm1 = vmand %vm785_vm5, %vm229_vm12  ;;  %vm374_vm12 = vcmp.eq.s32.totalorder %v118_v9, 5  ;;  %v967_v14 = vsub.s32 %v43_v6, %v775_v5 }
  0x14   :  { %vm246_vm3 = vmand %vm789_vm7, %vm230_vm14  ;;  %v261_v17 = vsel %vm245_vm1, 4.0, %v213_v15  ;;  %vm421_vm14 = vcmp.eq.s32.totalorder %v117_v8, 6 }
  0x15   :  { %v262_v18 = vsel %vm246_vm3, 4.0, %v214_v16  ;;  %vm293_vm6 = vmand %vm785_vm5, %vm277_vm0  ;;  %vm422_vm0 = vcmp.eq.s32.totalorder %v118_v9, 6 }
  0x16   :  { %vm294_vm9 = vmand %vm789_vm7, %vm278_vm2  ;;  %v309_v19 = vsel %vm293_vm6, 8.0, %v261_v17  ;;  %vm469_vm2 = vcmp.eq.s32.totalorder %v117_v8, 7 }
  0x17   :  { %v310_v21 = vsel %vm294_vm9, 8.0, %v262_v18  ;;  %vm341_vm11 = vmand %vm785_vm5, %vm325_vm4  ;;  %vm470_vm4 = vcmp.eq.s32.totalorder %v118_v9, 7  ;;  %vm83_vm9 = vcmp.lt.s32.totalorder %v46_v20, %v778_v7 }
  0x18   :  { %vm342_vm13 = vmand %vm789_vm7, %vm326_vm8  ;;  %v357_v23 = vsel %vm341_vm11, 16.0, %v309_v19  ;;  %vm65_vm8 = vcmp.ge.s32.totalorder %v46_v20, %v775_v5  ;;  %vm66_vm11 = vcmp.ge.s32.totalorder %v47_v22, %v775_v5 }
  0x19   :  { %v358_v24 = vsel %vm342_vm13, 16.0, %v310_v21  ;;  %vm389_vm15 = vmand %vm785_vm5, %vm373_vm10 }
  0x1a   :  { %vm390_vm1 = vmand %vm789_vm7, %vm374_vm12  ;;  %v405_v25 = vsel %vm389_vm15, 32.0, %v357_v23  ;;  %vm84_vm12 = vcmp.lt.s32.totalorder %v47_v22, %v778_v7 }
  0x1b   :  { %v406_v27 = vsel %vm390_vm1, 32.0, %v358_v24  ;;  %vm437_vm3 = vmand %vm785_vm5, %vm421_vm14  ;;  %vm131_vm14 = vcmp.eq.s32.totalorder %v822_v26, 0 }
  0x1c   :  { %vm438_vm6 = vmand %vm789_vm7, %vm422_vm0  ;;  %v453_v29 = vsel %vm437_vm3, 64.0, %v405_v25  ;;  %vm132_vm0 = vcmp.eq.s32.totalorder %v827_v28, 0 }
  0x1d   :  { %v454_v30 = vsel %vm438_vm6, 64.0, %v406_v27  ;;  %vm485_vm10 = vmand %vm785_vm5, %vm469_vm2  ;;  %vm179_vm5 = vcmp.eq.s32.totalorder %v822_v26, 1  ;;  %vm180_vm2 = vcmp.eq.s32.totalorder %v827_v28, 1 }
  0x1e   :  { %vm486_vm13 = vmand %vm789_vm7, %vm470_vm4  ;;  %v501_v31 = vsel %vm485_vm10, 128.0, %v453_v29  ;;  %vm227_vm4 = vcmp.eq.s32.totalorder %v822_v26, 2  ;;  %vm275_vm10 = vcmp.eq.s32.totalorder %v822_v26, 3  ;;  %v40_v29 = vadd.s32 48, %v771_v1 }
  0x1f   :  { %v502_v32 = vsel %vm486_vm13, 128.0, %v454_v30  ;;  %vm840_vm15 = vmand %vm65_vm8, %vm83_vm9  ;;  %vm228_vm8 = vcmp.eq.s32.totalorder %v827_v28, 2 }
  0x20   :  { %v510_v34 = vpack.c.bf16 %v502_v32, %v501_v31  ;;  %vm845_vm1 = vmand %vm66_vm11, %vm84_vm12  ;;  %vm276_vm12 = vcmp.eq.s32.totalorder %v827_v28, 3  ;;  %v41_v31 = vadd.s32 56, %v771_v1  ;;  %v1031_v35 = vsub.s32 %v40_v29, %v775_v5 }
  0x21   :  { %vm147_vm7 = vmand %vm840_vm15, %vm131_vm14  ;;  %vm323_vm14 = vcmp.eq.s32.totalorder %v822_v26, 4 }
  0x22   :  { %513 = vmatpush.bf16.msra.mxu0 %v510_v34  ;;  %vm148_vm3 = vmand %vm845_vm1, %vm132_vm0  ;;  %v163_v36 = vsel %vm147_vm7, 1.0, %v743_v12 }
  0x23   :  { %v164_v37 = vsel %vm148_vm3, 1.0, %v743_v12  ;;  %vm195_vm6 = vmand %vm840_vm15, %vm179_vm5  ;;  %vm324_vm5 = vcmp.eq.s32.totalorder %v827_v28, 4 }
  0x24   :  { %vm196_vm9 = vmand %vm845_vm1, %vm180_vm2  ;;  %v211_v38 = vsel %vm195_vm6, 2.0, %v163_v36  ;;  %vm371_vm2 = vcmp.eq.s32.totalorder %v822_v26, 5 }
  0x25   :  { %v212_v39 = vsel %vm196_vm9, 2.0, %v164_v37  ;;  %vm243_vm11 = vmand %vm840_vm15, %vm227_vm4  ;;  %vm372_vm4 = vcmp.eq.s32.totalorder %v827_v28, 5  ;;  %v1037_v37 = vsub.s32 %v41_v31, %v775_v5 }
  0x26   :  { %vm244_vm13 = vmand %vm845_vm1, %vm228_vm8  ;;  %v259_v40 = vsel %vm243_vm11, 4.0, %v211_v38  ;;  %vm419_vm8 = vcmp.eq.s32.totalorder %v822_v26, 6 }
  0x27   :  { %v260_v41 = vsel %vm244_vm13, 4.0, %v212_v39  ;;  %vm291_vm0 = vmand %vm840_vm15, %vm275_vm10  ;;  %vm420_vm10 = vcmp.eq.s32.totalorder %v827_v28, 6 }
  0x28   :  { %vm292_vm7 = vmand %vm845_vm1, %vm276_vm12  ;;  %v307_v42 = vsel %vm291_vm0, 8.0, %v259_v40  ;;  %vm467_vm12 = vcmp.eq.s32.totalorder %v822_v26, 7 }
  0x29   :  { %v308_v44 = vsel %vm292_vm7, 8.0, %v260_v41  ;;  %vm339_vm3 = vmand %vm840_vm15, %vm323_vm14  ;;  %vm468_vm14 = vcmp.eq.s32.totalorder %v827_v28, 7  ;;  %vm81_vm7 = vcmp.lt.s32.totalorder %v44_v43, %v778_v7 }
  0x2a   :  { %vm340_vm6 = vmand %vm845_vm1, %vm324_vm5  ;;  %v355_v46 = vsel %vm339_vm3, 16.0, %v307_v42  ;;  %vm63_vm5 = vcmp.ge.s32.totalorder %v44_v43, %v775_v5  ;;  %vm64_vm3 = vcmp.ge.s32.totalorder %v45_v45, %v775_v5 }
  0x2b   :  { %v356_v47 = vsel %vm340_vm6, 16.0, %v308_v44  ;;  %vm387_vm9 = vmand %vm840_vm15, %vm371_vm2 }
  0x2c   :  { %vm388_vm11 = vmand %vm845_vm1, %vm372_vm4  ;;  %v403_v48 = vsel %vm387_vm9, 32.0, %v355_v46  ;;  %vm82_vm4 = vcmp.lt.s32.totalorder %v45_v45, %v778_v7 }
  0x2d   :  { %v404_v50 = vsel %vm388_vm11, 32.0, %v356_v47  ;;  %vm435_vm13 = vmand %vm840_vm15, %vm419_vm8  ;;  %vm129_vm8 = vcmp.eq.s32.totalorder %v891_v49, 0 }
  0x2e   :  { %vm436_vm0 = vmand %vm845_vm1, %vm420_vm10  ;;  %v451_v52 = vsel %vm435_vm13, 64.0, %v403_v48  ;;  %vm130_vm10 = vcmp.eq.s32.totalorder %v897_v51, 0 }
  0x2f   :  { %v452_v53 = vsel %vm436_vm0, 64.0, %v404_v50  ;;  %vm483_vm2 = vmand %vm840_vm15, %vm467_vm12  ;;  %vm177_vm15 = vcmp.eq.s32.totalorder %v891_v49, 1  ;;  %vm178_vm12 = vcmp.eq.s32.totalorder %v897_v51, 1 }
  0x30   :  { %vm484_vm6 = vmand %vm845_vm1, %vm468_vm14  ;;  %v499_v54 = vsel %vm483_vm2, 128.0, %v451_v52  ;;  %vm225_vm14 = vcmp.eq.s32.totalorder %v891_v49, 2  ;;  %vm273_vm2 = vcmp.eq.s32.totalorder %v891_v49, 3  ;;  %v38_v52 = vadd.s32 32, %v771_v1 }
  0x31   :  { %v500_v55 = vsel %vm484_vm6, 128.0, %v452_v53  ;;  %vm910_vm9 = vmand %vm63_vm5, %vm81_vm7  ;;  %vm226_vm5 = vcmp.eq.s32.totalorder %v897_v51, 2 }
  0x32   :  { %v509_v57 = vpack.c.bf16 %v500_v55, %v499_v54  ;;  %vm915_vm11 = vmand %vm64_vm3, %vm82_vm4  ;;  %vm274_vm4 = vcmp.eq.s32.totalorder %v897_v51, 3  ;;  %v39_v54 = vadd.s32 40, %v771_v1  ;;  %v1101_v58 = vsub.s32 %v38_v52, %v775_v5 }
  0x33   :  { %vm145_vm1 = vmand %vm910_vm9, %vm129_vm8  ;;  %vm321_vm8 = vcmp.eq.s32.totalorder %v891_v49, 4 }
  0x34   :  { %514 = vmatpush.bf16.msra.mxu0 %v509_v57  ;;  %vm146_vm13 = vmand %vm915_vm11, %vm130_vm10  ;;  %v161_v59 = vsel %vm145_vm1, 1.0, %v743_v12 }
  0x35   :  { %v162_v60 = vsel %vm146_vm13, 1.0, %v743_v12  ;;  %vm193_vm0 = vmand %vm910_vm9, %vm177_vm15  ;;  %vm322_vm15 = vcmp.eq.s32.totalorder %v897_v51, 4 }
  0x36   :  { %vm194_vm7 = vmand %vm915_vm11, %vm178_vm12  ;;  %v209_v61 = vsel %vm193_vm0, 2.0, %v161_v59  ;;  %vm369_vm12 = vcmp.eq.s32.totalorder %v891_v49, 5 }
  0x37   :  { %v210_v62 = vsel %vm194_vm7, 2.0, %v162_v60  ;;  %vm241_vm3 = vmand %vm910_vm9, %vm225_vm14  ;;  %vm370_vm14 = vcmp.eq.s32.totalorder %v897_v51, 5  ;;  %v1107_v60 = vsub.s32 %v39_v54, %v775_v5 }
  0x38   :  { %vm242_vm6 = vmand %vm915_vm11, %vm226_vm5  ;;  %v257_v63 = vsel %vm241_vm3, 4.0, %v209_v61  ;;  %vm417_vm5 = vcmp.eq.s32.totalorder %v891_v49, 6 }
  0x39   :  { %v258_v0 = vsel %vm242_vm6, 4.0, %v210_v62  ;;  %vm289_vm10 = vmand %vm910_vm9, %vm273_vm2  ;;  %vm418_vm2 = vcmp.eq.s32.totalorder %v897_v51, 6 }
  0x3a   :  { %vm290_vm1 = vmand %vm915_vm11, %vm274_vm4  ;;  %v305_v2 = vsel %vm289_vm10, 8.0, %v257_v63  ;;  %vm465_vm4 = vcmp.eq.s32.totalorder %v891_v49, 7 }
  0x3b   :  { %v306_v4 = vsel %vm290_vm1, 8.0, %v258_v0  ;;  %vm337_vm13 = vmand %vm910_vm9, %vm321_vm8  ;;  %vm466_vm8 = vcmp.eq.s32.totalorder %v897_v51, 7  ;;  %vm79_vm1 = vcmp.lt.s32.totalorder %v42_v3, %v778_v7 }
  0x3c   :  { %vm338_vm0 = vmand %vm915_vm11, %vm322_vm15  ;;  %v353_v8 = vsel %vm337_vm13, 16.0, %v305_v2  ;;  %vm61_vm15 = vcmp.ge.s32.totalorder %v42_v3, %v775_v5  ;;  %vm62_vm13 = vcmp.ge.s32.totalorder %v43_v6, %v775_v5 }
  0x3d   :  { %v354_v9 = vsel %vm338_vm0, 16.0, %v306_v4  ;;  %vm385_vm7 = vmand %vm910_vm9, %vm369_vm12 }
  0x3e   :  { %vm386_vm3 = vmand %vm915_vm11, %vm370_vm14  ;;  %v401_v10 = vsel %vm385_vm7, 32.0, %v353_v8  ;;  %vm80_vm14 = vcmp.lt.s32.totalorder %v43_v6, %v778_v7 }
  0x3f   :  { %v402_v13 = vsel %vm386_vm3, 32.0, %v354_v9  ;;  %vm433_vm6 = vmand %vm910_vm9, %vm417_vm5  ;;  %vm127_vm5 = vcmp.eq.s32.totalorder %v961_v11, 0 }
  0x40   :  { %vm434_vm10 = vmand %vm915_vm11, %vm418_vm2  ;;  %v449_v15 = vsel %vm433_vm6, 64.0, %v401_v10  ;;  %vm128_vm2 = vcmp.eq.s32.totalorder %v967_v14, 0 }
  0x41   :  { %v450_v16 = vsel %vm434_vm10, 64.0, %v402_v13  ;;  %vm481_vm12 = vmand %vm910_vm9, %vm465_vm4  ;;  %vm175_vm9 = vcmp.eq.s32.totalorder %v961_v11, 1  ;;  %vm176_vm4 = vcmp.eq.s32.totalorder %v967_v14, 1 }
  0x42   :  { %vm482_vm0 = vmand %vm915_vm11, %vm466_vm8  ;;  %v497_v17 = vsel %vm481_vm12, 128.0, %v449_v15  ;;  %vm223_vm8 = vcmp.eq.s32.totalorder %v961_v11, 2  ;;  %vm271_vm12 = vcmp.eq.s32.totalorder %v961_v11, 3  ;;  %v36_v15 = vadd.s32 16, %v771_v1 }
  0x43   :  { %v498_v18 = vsel %vm482_vm0, 128.0, %v450_v16  ;;  %vm980_vm7 = vmand %vm61_vm15, %vm79_vm1  ;;  %vm224_vm15 = vcmp.eq.s32.totalorder %v967_v14, 2 }
  0x44   :  { %v508_v20 = vpack.c.bf16 %v498_v18, %v497_v17  ;;  %vm985_vm3 = vmand %vm62_vm13, %vm80_vm14  ;;  %vm272_vm14 = vcmp.eq.s32.totalorder %v967_v14, 3  ;;  %v37_v17 = vadd.s32 24, %v771_v1  ;;  %v1171_v21 = vsub.s32 %v36_v15, %v775_v5 }
  0x45   :  { %vm143_vm11 = vmand %vm980_vm7, %vm127_vm5  ;;  %vm319_vm5 = vcmp.eq.s32.totalorder %v961_v11, 4 }
  0x46   :  { %515 = vmatpush.bf16.msra.mxu0 %v508_v20  ;;  %vm144_vm6 = vmand %vm985_vm3, %vm128_vm2  ;;  %v159_v22 = vsel %vm143_vm11, 1.0, %v743_v12 }
  0x47   :  { %v160_v23 = vsel %vm144_vm6, 1.0, %v743_v12  ;;  %vm191_vm10 = vmand %vm980_vm7, %vm175_vm9  ;;  %vm320_vm9 = vcmp.eq.s32.totalorder %v967_v14, 4 }
  0x48   :  { %vm192_vm1 = vmand %vm985_vm3, %vm176_vm4  ;;  %v207_v24 = vsel %vm191_vm10, 2.0, %v159_v22  ;;  %vm367_vm4 = vcmp.eq.s32.totalorder %v961_v11, 5 }
  0x49   :  { %v208_v25 = vsel %vm192_vm1, 2.0, %v160_v23  ;;  %vm239_vm13 = vmand %vm980_vm7, %vm223_vm8  ;;  %vm368_vm8 = vcmp.eq.s32.totalorder %v967_v14, 5  ;;  %v1177_v23 = vsub.s32 %v37_v17, %v775_v5 }
  0x4a   :  { %vm240_vm0 = vmand %vm985_vm3, %vm224_vm15  ;;  %v255_v26 = vsel %vm239_vm13, 4.0, %v207_v24  ;;  %vm415_vm15 = vcmp.eq.s32.totalorder %v961_v11, 6 }
  0x4b   :  { %v256_v27 = vsel %vm240_vm0, 4.0, %v208_v25  ;;  %vm287_vm2 = vmand %vm980_vm7, %vm271_vm12  ;;  %vm416_vm12 = vcmp.eq.s32.totalorder %v967_v14, 6 }
  0x4c   :  { %vm288_vm11 = vmand %vm985_vm3, %vm272_vm14  ;;  %v303_v28 = vsel %vm287_vm2, 8.0, %v255_v26  ;;  %vm463_vm14 = vcmp.eq.s32.totalorder %v961_v11, 7 }
  0x4d   :  { %v304_v30 = vsel %vm288_vm11, 8.0, %v256_v27  ;;  %vm335_vm6 = vmand %vm980_vm7, %vm319_vm5  ;;  %vm464_vm5 = vcmp.eq.s32.totalorder %v967_v14, 7  ;;  %vm77_vm11 = vcmp.lt.s32.totalorder %v40_v29, %v778_v7 }
  0x4e   :  { %vm336_vm10 = vmand %vm985_vm3, %vm320_vm9  ;;  %v351_v32 = vsel %vm335_vm6, 16.0, %v303_v28  ;;  %vm59_vm9 = vcmp.ge.s32.totalorder %v40_v29, %v775_v5  ;;  %vm60_vm6 = vcmp.ge.s32.totalorder %v41_v31, %v775_v5 }
  0x4f   :  { %v352_v33 = vsel %vm336_vm10, 16.0, %v304_v30  ;;  %vm383_vm1 = vmand %vm980_vm7, %vm367_vm4 }
  0x50   :  { %vm384_vm13 = vmand %vm985_vm3, %vm368_vm8  ;;  %v399_v34 = vsel %vm383_vm1, 32.0, %v351_v32  ;;  %vm78_vm8 = vcmp.lt.s32.totalorder %v41_v31, %v778_v7 }
  0x51   :  { %v400_v36 = vsel %vm384_vm13, 32.0, %v352_v33  ;;  %vm431_vm0 = vmand %vm980_vm7, %vm415_vm15  ;;  %vm125_vm15 = vcmp.eq.s32.totalorder %v1031_v35, 0 }
  0x52   :  { %vm432_vm2 = vmand %vm985_vm3, %vm416_vm12  ;;  %v447_v38 = vsel %vm431_vm0, 64.0, %v399_v34  ;;  %vm126_vm12 = vcmp.eq.s32.totalorder %v1037_v37, 0 }
  0x53   :  { %v448_v39 = vsel %vm432_vm2, 64.0, %v400_v36  ;;  %vm479_vm4 = vmand %vm980_vm7, %vm463_vm14  ;;  %vm173_vm7 = vcmp.eq.s32.totalorder %v1031_v35, 1  ;;  %vm174_vm14 = vcmp.eq.s32.totalorder %v1037_v37, 1  ;;  %v1220_v36 = vld [vmem:[#allocation2] sm:$0xff] }
  0x54   :  { %vm480_vm10 = vmand %vm985_vm3, %vm464_vm5  ;;  %v495_v40 = vsel %vm479_vm4, 128.0, %v447_v38  ;;  %vm221_vm5 = vcmp.eq.s32.totalorder %v1031_v35, 2  ;;  %vm269_vm4 = vcmp.eq.s32.totalorder %v1031_v35, 3 }
  0x55   :  { %v496_v41 = vsel %vm480_vm10, 128.0, %v448_v39  ;;  %vm1050_vm1 = vmand %vm59_vm9, %vm77_vm11  ;;  %vm222_vm9 = vcmp.eq.s32.totalorder %v1037_v37, 2 }
  0x56   :  { %v507_v43 = vpack.c.bf16 %v496_v41, %v495_v40  ;;  %vm1055_vm13 = vmand %vm60_vm6, %vm78_vm8  ;;  %vm270_vm8 = vcmp.eq.s32.totalorder %v1037_v37, 3  ;;  %v35_v41 = vadd.s32 8, %v771_v1 }
  0x57   :  { %vm141_vm3 = vmand %vm1050_vm1, %vm125_vm15  ;;  %vm317_vm15 = vcmp.eq.s32.totalorder %v1031_v35, 4 }
  0x58   :  { %516 = vmatpush.bf16.msra.mxu0 %v507_v43  ;;  %vm142_vm0 = vmand %vm1055_vm13, %vm126_vm12  ;;  %v157_v45 = vsel %vm141_vm3, 1.0, %v743_v12 }
  0x59   :  { %v158_v46 = vsel %vm142_vm0, 1.0, %v743_v12  ;;  %vm189_vm2 = vmand %vm1050_vm1, %vm173_vm7  ;;  %vm318_vm7 = vcmp.eq.s32.totalorder %v1037_v37, 4 }
  0x5a   :  { %vm190_vm11 = vmand %vm1055_vm13, %vm174_vm14  ;;  %v205_v47 = vsel %vm189_vm2, 2.0, %v157_v45  ;;  %vm365_vm14 = vcmp.eq.s32.totalorder %v1031_v35, 5 }
  0x5b   :  { %v206_v48 = vsel %vm190_vm11, 2.0, %v158_v46  ;;  %vm237_vm6 = vmand %vm1050_vm1, %vm221_vm5  ;;  %vm366_vm5 = vcmp.eq.s32.totalorder %v1037_v37, 5  ;;  %v1248_v46 = vsub.s32 %v771_v1, %v775_v5 }
  0x5c   :  { %vm238_vm10 = vmand %vm1055_vm13, %vm222_vm9  ;;  %v253_v49 = vsel %vm237_vm6, 4.0, %v205_v47  ;;  %vm413_vm9 = vcmp.eq.s32.totalorder %v1031_v35, 6 }
  0x5d   :  { %v254_v50 = vsel %vm238_vm10, 4.0, %v206_v48  ;;  %vm285_vm12 = vmand %vm1050_vm1, %vm269_vm4  ;;  %vm414_vm4 = vcmp.eq.s32.totalorder %v1037_v37, 6  ;;  %v104_v48 = vsub.s32 %v35_v41, %v775_v5 }
  0x5e   :  { %vm286_vm3 = vmand %vm1055_vm13, %vm270_vm8  ;;  %v301_v51 = vsel %vm285_vm12, 8.0, %v253_v49  ;;  %vm461_vm8 = vcmp.eq.s32.totalorder %v1031_v35, 7 }
  0x5f   :  { %v302_v53 = vsel %vm286_vm3, 8.0, %v254_v50  ;;  %vm333_vm0 = vmand %vm1050_vm1, %vm317_vm15  ;;  %vm462_vm15 = vcmp.eq.s32.totalorder %v1037_v37, 7  ;;  %vm75_vm3 = vcmp.lt.s32.totalorder %v38_v52, %v778_v7 }
  0x60   :  { %vm334_vm2 = vmand %vm1055_vm13, %vm318_vm7  ;;  %v349_v55 = vsel %vm333_vm0, 16.0, %v301_v51  ;;  %vm57_vm7 = vcmp.ge.s32.totalorder %v38_v52, %v775_v5  ;;  %vm58_vm0 = vcmp.ge.s32.totalorder %v39_v54, %v775_v5 }
  0x61   :  { %v350_v56 = vsel %vm334_vm2, 16.0, %v302_v53  ;;  %vm381_vm11 = vmand %vm1050_vm1, %vm365_vm14 }
  0x62   :  { %vm382_vm6 = vmand %vm1055_vm13, %vm366_vm5  ;;  %v397_v57 = vsel %vm381_vm11, 32.0, %v349_v55  ;;  %vm76_vm5 = vcmp.lt.s32.totalorder %v39_v54, %v778_v7 }
  0x63   :  { %v398_v59 = vsel %vm382_vm6, 32.0, %v350_v56  ;;  %vm429_vm10 = vmand %vm1050_vm1, %vm413_vm9  ;;  %vm123_vm9 = vcmp.eq.s32.totalorder %v1101_v58, 0 }
  0x64   :  { %vm430_vm12 = vmand %vm1055_vm13, %vm414_vm4  ;;  %v445_v61 = vsel %vm429_vm10, 64.0, %v397_v57  ;;  %vm124_vm4 = vcmp.eq.s32.totalorder %v1107_v60, 0 }
  0x65   :  { %v446_v62 = vsel %vm430_vm12, 64.0, %v398_v59  ;;  %vm477_vm14 = vmand %vm1050_vm1, %vm461_vm8  ;;  %vm171_vm1 = vcmp.eq.s32.totalorder %v1101_v58, 1  ;;  %vm172_vm8 = vcmp.eq.s32.totalorder %v1107_v60, 1 }
  0x66   :  { %vm478_vm2 = vmand %vm1055_vm13, %vm462_vm15  ;;  %v493_v63 = vsel %vm477_vm14, 128.0, %v445_v61  ;;  %vm219_vm15 = vcmp.eq.s32.totalorder %v1101_v58, 2  ;;  %vm267_vm14 = vcmp.eq.s32.totalorder %v1101_v58, 3 }
  0x67   :  { %v494_v0 = vsel %vm478_vm2, 128.0, %v446_v62  ;;  %vm1120_vm11 = vmand %vm57_vm7, %vm75_vm3  ;;  %vm220_vm7 = vcmp.eq.s32.totalorder %v1107_v60, 2 }
  0x68   :  { %v506_v3 = vpack.c.bf16 %v494_v0, %v493_v63  ;;  %vm1125_vm6 = vmand %vm58_vm0, %vm76_vm5  ;;  %vm268_vm5 = vcmp.eq.s32.totalorder %v1107_v60, 3 }
  0x69   :  { %vm139_vm13 = vmand %vm1120_vm11, %vm123_vm9  ;;  %vm315_vm9 = vcmp.eq.s32.totalorder %v1101_v58, 4 }
  0x6a   :  { %517 = vmatpush.bf16.msra.mxu0 %v506_v3  ;;  %vm140_vm10 = vmand %vm1125_vm6, %vm124_vm4  ;;  %v155_v6 = vsel %vm139_vm13, 1.0, %v743_v12 }
  0x6b   :  { %v156_v8 = vsel %vm140_vm10, 1.0, %v743_v12  ;;  %vm187_vm12 = vmand %vm1120_vm11, %vm171_vm1  ;;  %vm316_vm1 = vcmp.eq.s32.totalorder %v1107_v60, 4 }
  0x6c   :  { %vm188_vm3 = vmand %vm1125_vm6, %vm172_vm8  ;;  %v203_v9 = vsel %vm187_vm12, 2.0, %v155_v6  ;;  %vm363_vm8 = vcmp.eq.s32.totalorder %v1101_v58, 5 }
  0x6d   :  { %v204_v10 = vsel %vm188_vm3, 2.0, %v156_v8  ;;  %vm235_vm0 = vmand %vm1120_vm11, %vm219_vm15  ;;  %vm364_vm15 = vcmp.eq.s32.totalorder %v1107_v60, 5  ;;  %v744_v8 = vmov 1.0|1.0  }
  0x6e   :  { %vm236_vm2 = vmand %vm1125_vm6, %vm220_vm7  ;;  %v251_v11 = vsel %vm235_vm0, 4.0, %v203_v9  ;;  %vm411_vm7 = vcmp.eq.s32.totalorder %v1101_v58, 6  ;;  %v529_v9 = vand.u32 2147483647, %v1220_v36 }
  0x6f   :  { %v252_v13 = vsel %vm236_vm2, 4.0, %v204_v10  ;;  %vm283_vm4 = vmand %vm1120_vm11, %vm267_vm14  ;;  %vm412_vm14 = vcmp.eq.s32.totalorder %v1107_v60, 6 }
  0x70   :  { %vm284_vm13 = vmand %vm1125_vm6, %vm268_vm5  ;;  %v299_v14 = vsel %vm283_vm4, 8.0, %v251_v11  ;;  %vm459_vm5 = vcmp.eq.s32.totalorder %v1101_v58, 7  ;;  %v530_v10 = vsub.f32 0.0, %v529_v9 }
  0x71   :  { %v300_v16 = vsel %vm284_vm13, 8.0, %v252_v13  ;;  %vm331_vm10 = vmand %vm1120_vm11, %vm315_vm9  ;;  %vm460_vm9 = vcmp.eq.s32.totalorder %v1107_v60, 7  ;;  %vm73_vm13 = vcmp.lt.s32.totalorder %v36_v15, %v778_v7 }
  0x72   :  { %vm332_vm12 = vmand %vm1125_vm6, %vm316_vm1  ;;  %v347_v18 = vsel %vm331_vm10, 16.0, %v299_v14  ;;  %vm55_vm1 = vcmp.ge.s32.totalorder %v36_v15, %v775_v5  ;;  %vm56_vm10 = vcmp.ge.s32.totalorder %v37_v17, %v775_v5  ;;  %v531_v11 = vmul.f32 1.442695, %v530_v10 }
  0x73   :  { %v348_v19 = vsel %vm332_vm12, 16.0, %v300_v16  ;;  %vm379_vm3 = vmand %vm1120_vm11, %vm363_vm8 }
  0x74   :  { %vm380_vm0 = vmand %vm1125_vm6, %vm364_vm15  ;;  %v395_v20 = vsel %vm379_vm3, 32.0, %v347_v18  ;;  %vm74_vm15 = vcmp.lt.s32.totalorder %v37_v17, %v778_v7  ;;  %634 = vpow2.f32 %v531_v11 }
  0x75   :  { %v396_v22 = vsel %vm380_vm0, 32.0, %v348_v19  ;;  %vm427_vm2 = vmand %vm1120_vm11, %vm411_vm7  ;;  %vm121_vm7 = vcmp.eq.s32.totalorder %v1171_v21, 0 }
  0x76   :  { %vm428_vm4 = vmand %vm1125_vm6, %vm412_vm14  ;;  %v443_v24 = vsel %vm427_vm2, 64.0, %v395_v20  ;;  %vm122_vm14 = vcmp.eq.s32.totalorder %v1177_v23, 0 }
  0x77   :  { %v444_v25 = vsel %vm428_vm4, 64.0, %v396_v22  ;;  %vm475_vm8 = vmand %vm1120_vm11, %vm459_vm5  ;;  %vm169_vm11 = vcmp.eq.s32.totalorder %v1171_v21, 1  ;;  %vm170_vm5 = vcmp.eq.s32.totalorder %v1177_v23, 1 }
  0x78   :  { %vm476_vm12 = vmand %vm1125_vm6, %vm460_vm9  ;;  %v491_v26 = vsel %vm475_vm8, 128.0, %v443_v24  ;;  %vm217_vm9 = vcmp.eq.s32.totalorder %v1171_v21, 2  ;;  %vm265_vm8 = vcmp.eq.s32.totalorder %v1171_v21, 3 }
  0x79   :  { %v492_v27 = vsel %vm476_vm12, 128.0, %v444_v25  ;;  %vm1190_vm3 = vmand %vm55_vm1, %vm73_vm13  ;;  %vm218_vm1 = vcmp.eq.s32.totalorder %v1177_v23, 2 }
  0x7a   :  { %v505_v29 = vpack.c.bf16 %v492_v27, %v491_v26  ;;  %vm1195_vm0 = vmand %vm56_vm10, %vm74_vm15  ;;  %vm266_vm15 = vcmp.eq.s32.totalorder %v1177_v23, 3  ;;  %v635_v13 = vpop.eup %634 }
  0x7b   :  { %vm137_vm6 = vmand %vm1190_vm3, %vm121_vm7  ;;  %vm313_vm7 = vcmp.eq.s32.totalorder %v1171_v21, 4  ;;  %v533_v14 = vadd.f32 1.0, %v635_v13 }
  0x7c   :  { %518 = vmatpush.bf16.msra.mxu0 %v505_v29  ;;  %vm138_vm2 = vmand %vm1195_vm0, %vm122_vm14  ;;  %v153_v31 = vsel %vm137_vm6, 1.0, %v743_v12  ;;  %vm29_vm6 = vcmp.lt.f32.partialorder %v1220_v36, 0.0 }
  0x7d   :  { %v154_v32 = vsel %vm138_vm2, 1.0, %v743_v12  ;;  %vm185_vm4 = vmand %vm1190_vm3, %vm169_vm11  ;;  %vm314_vm11 = vcmp.eq.s32.totalorder %v1177_v23, 4  ;;  %vm361_vm2 = vcmp.eq.s32.totalorder %v1171_v21, 5  ;;  %v30_v39 = vsel %vm29_vm6, -1.0, %v743_v12 }
  0x7e   :  { %vm186_vm13 = vmand %vm1195_vm0, %vm170_vm5  ;;  %v201_v33 = vsel %vm185_vm4, 2.0, %v153_v31  ;;  %636 = vrcp.f32 %v533_v14  ;;  %v545_v19 = vand.u32 2147483648, %v533_v14 }
  0x7f   :  { %v202_v34 = vsel %vm186_vm13, 2.0, %v154_v32  ;;  %vm233_vm10 = vmand %vm1190_vm3, %vm217_vm9  ;;  %vm28_vm9 = vcmp.gt.f32.partialorder %v1220_v36, 0.0  ;;  %638 = vlog2.f32 %v533_v14 }
  0x80   :  { %vm234_vm12 = vmand %vm1195_vm0, %vm218_vm1  ;;  %v249_v35 = vsel %vm233_vm10, 4.0, %v201_v33  ;;  %vm362_vm1 = vcmp.eq.s32.totalorder %v1177_v23, 5  ;;  %v31_v42 = vsel %vm28_vm9, 1.0, %v30_v39  ;;  %v546_v22 = vor.u32 1.1754944e-38, %v545_v19 }
  0x81   :  { %v250_v37 = vsel %vm234_vm12, 4.0, %v202_v34  ;;  %vm281_vm14 = vmand %vm1190_vm3, %vm265_vm8  ;;  %vm409_vm8 = vcmp.eq.s32.totalorder %v1171_v21, 6  ;;  %32 = vst [vmem:[#allocation5] sm:$0xff] %v31_v42 }
  0x82   :  { %vm282_vm5 = vmand %vm1195_vm0, %vm266_vm15  ;;  %v297_v38 = vsel %vm281_vm14, 8.0, %v249_v35  ;;  %vm410_vm15 = vcmp.eq.s32.totalorder %v1177_v23, 6  ;;  %583 = dma.vmem_to_hbm [thread:$0]  %s579_s20, 128, %s581_s18, [#allocation4]  }
  0x83   :  { %v298_v40 = vsel %vm282_vm5, 8.0, %v250_v37  ;;  %vm329_vm4 = vmand %vm1190_vm3, %vm313_vm7  ;;  %vm457_vm7 = vcmp.eq.s32.totalorder %v1171_v21, 7  ;;  %vm53_vm5 = vcmp.ge.s32.totalorder %v771_v1, %v775_v5  ;;  %v543_v21 = vand.u32 2147483647, %v533_v14 }
  0x84   :  { %vm330_vm13 = vmand %vm1195_vm0, %vm314_vm11  ;;  %v345_v43 = vsel %vm329_vm4, 16.0, %v297_v38  ;;  %vm458_vm11 = vcmp.eq.s32.totalorder %v1177_v23, 7  ;;  %v637_v15 = vpop.eup %636  ;;  %v552_v23 = vmax.f32 %v1220_v36, 0.0 }
  0x85   :  { %v346_v44 = vsel %vm330_vm13, 16.0, %v298_v40  ;;  %vm377_vm10 = vmand %vm1190_vm3, %vm361_vm2  ;;  %vm71_vm2 = vcmp.lt.s32.totalorder %v771_v1, %v778_v7  ;;  %vm72_vm13 = vcmp.lt.s32.totalorder %v35_v41, %v778_v7  ;;  %v535_v16 = vmul.f32 %v637_v15, %v533_v14  ;;  %v639_v25 = vpop.eup %638 }
  0x86   :  { %vm378_vm12 = vmand %vm1195_vm0, %vm362_vm1  ;;  %v393_v45 = vsel %vm377_vm10, 32.0, %v345_v43  ;;  %vm54_vm1 = vcmp.ge.s32.totalorder %v35_v41, %v775_v5  ;;  %vm119_vm10 = vcmp.eq.s32.totalorder %v1248_v46, 0  ;;  %v554_v29 = vmul.f32 0.6931472, %v639_v25 }
  0x87   :  { %v394_v47 = vsel %vm378_vm12, 32.0, %v346_v44  ;;  %vm425_vm14 = vmand %vm1190_vm3, %vm409_vm8  ;;  %vm120_vm12 = vcmp.eq.s32.totalorder %v104_v48, 0  ;;  %v536_v17 = vsub.f32 1.0, %v535_v16 }
  0x88   :  { %vm426_vm6 = vmand %vm1195_vm0, %vm410_vm15  ;;  %v441_v49 = vsel %vm425_vm14, 64.0, %v393_v45  ;;  %v555_v30 = vadd.f32 %v554_v29, %v552_v23 }
  0x89   :  { %v442_v50 = vsel %vm426_vm6, 64.0, %v394_v47  ;;  %vm473_vm4 = vmand %vm1190_vm3, %vm457_vm7  ;;  %vm167_vm3 = vcmp.eq.s32.totalorder %v1248_v46, 1  ;;  %vm215_vm6 = vcmp.eq.s32.totalorder %v1248_v46, 2  ;;  %v537_v18 = vmul.f32 %v637_v15, %v536_v17 }
  0x8a   :  { %vm474_vm8 = vmand %vm1195_vm0, %vm458_vm11  ;;  %v489_v51 = vsel %vm473_vm4, 128.0, %v441_v49  ;;  %vm168_vm0 = vcmp.eq.s32.totalorder %v104_v48, 1 }
  0x8b   :  { %v490_v52 = vsel %vm474_vm8, 128.0, %v442_v50  ;;  %vm1267_vm15 = vmand %vm53_vm5, %vm71_vm2  ;;  %vm216_vm2 = vcmp.eq.s32.totalorder %v104_v48, 2  ;;  %vm264_vm8 = vcmp.eq.s32.totalorder %v104_v48, 3  ;;  %v538_v20 = vadd.f32 %v637_v15, %v537_v18 }
  0x8c   :  { %v504_v1 = vpack.c.bf16 %v490_v52, %v489_v51  ;;  %vm1271_vm14 = vmand %vm54_vm1, %vm72_vm13  ;;  %vm263_vm1 = vcmp.eq.s32.totalorder %v1248_v46, 3 }
  0x8d   :  { %vm135_vm7 = vmand %vm1267_vm15, %vm119_vm10 }
  0x8e   :  { %519 = vmatpush.bf16.msra.mxu0 %v504_v1  ;;  %vm136_vm11 = vmand %vm1271_vm14, %vm120_vm12  ;;  %v151_v5 = vsel %vm135_vm7, 1.0, %v743_v12  ;;  %vm311_vm12 = vcmp.eq.s32.totalorder %v1248_v46, 4  ;;  %vm312_vm7 = vcmp.eq.s32.totalorder %v104_v48, 4 }
  0x8f   :  { %v152_v7 = vsel %vm136_vm11, 1.0, %v743_v12  ;;  %vm183_vm5 = vmand %vm1267_vm15, %vm167_vm3  ;;  %vm359_vm11 = vcmp.eq.s32.totalorder %v1248_v46, 5 }
  0x90   :  { %vm184_vm4 = vmand %vm1271_vm14, %vm168_vm0  ;;  %v199_v55 = vsel %vm183_vm5, 2.0, %v151_v5  ;;  %vm360_vm5 = vcmp.eq.s32.totalorder %v104_v48, 5 }
  0x91   :  { %v200_v56 = vsel %vm184_vm4, 2.0, %v152_v7  ;;  %vm231_vm13 = vmand %vm1267_vm15, %vm215_vm6  ;;  %vm407_vm4 = vcmp.eq.s32.totalorder %v1248_v46, 6 }
  0x92   :  { %vm232_vm10 = vmand %vm1271_vm14, %vm216_vm2  ;;  %v247_v57 = vsel %vm231_vm13, 4.0, %v199_v55  ;;  %vm408_vm13 = vcmp.eq.s32.totalorder %v104_v48, 6 }
  0x93   :  { %v248_v12 = vsel %vm232_vm10, 4.0, %v200_v56  ;;  %vm279_vm3 = vmand %vm1267_vm15, %vm263_vm1  ;;  %vm455_vm10 = vcmp.eq.s32.totalorder %v1248_v46, 7 }
  0x94   :  { %vm280_vm0 = vmand %vm1271_vm14, %vm264_vm8  ;;  %v295_v58 = vsel %vm279_vm3, 8.0, %v247_v57  ;;  %vm456_vm3 = vcmp.eq.s32.totalorder %v104_v48, 7 }
  0x95   :  { %v296_v59 = vsel %vm280_vm0, 8.0, %v248_v12  ;;  %vm327_vm6 = vmand %vm1267_vm15, %vm311_vm12 }
  0x96   :  { %vm328_vm2 = vmand %vm1271_vm14, %vm312_vm7  ;;  %v343_v60 = vsel %vm327_vm6, 16.0, %v295_v58 }
  0x97   :  { %v344_v61 = vsel %vm328_vm2, 16.0, %v296_v59  ;;  %vm375_vm1 = vmand %vm1267_vm15, %vm359_vm11  ;;  %vm544_vm2 = vcmp.eq.f32.partialorder %v543_v21, 8.507059e+37 }
  0x98   :  { %vm376_vm8 = vmand %vm1271_vm14, %vm360_vm5  ;;  %v391_v62 = vsel %vm375_vm1, 32.0, %v343_v60 }
  0x99   :  { %v392_v63 = vsel %vm376_vm8, 32.0, %v344_v61  ;;  %vm423_vm12 = vmand %vm1267_vm15, %vm407_vm4  ;;  %vm570_vm4 = vcmask 1040384  }
  0x9a   :  { %vm424_vm7 = vmand %vm1271_vm14, %vm408_vm13  ;;  %v439_v0 = vsel %vm423_vm12, 64.0, %v391_v62  ;;  %vm527_vm13 = vcmask 130048  }
  0x9b   :  { %v440_v2 = vsel %vm424_vm7, 64.0, %v392_v63  ;;  %vm471_vm0 = vmand %vm1267_vm15, %vm455_vm10  ;;  %vm539_vm15 = vweird.f32 %v533_v14 }
  0x9c   :  { %vm472_vm11 = vmand %vm1271_vm14, %vm456_vm3  ;;  %v487_v3 = vsel %vm471_vm0, 128.0, %v439_v0  ;;  %vm540_vm14 = vweird.f32 %v637_v15 }
  0x9d   :  { %v488_v4 = vsel %vm472_vm11, 128.0, %v440_v2  ;;  %vm621_vm6 = vmpackc.low %vm28_vm9, %vm28_vm9  ;;  %vm549_vm9 = vcmp.ge.f32.partialorder %v1220_v36, 0.0 }
  0x9e   :  { %v503_v6 = vpack.c.bf16 %v488_v4, %v487_v3  ;;  %vm541_vm5 = vmor %vm539_vm15, %vm540_vm14  ;;  %v550_v27 = vsel %vm549_vm9, 1.0, %v635_v13 }
  0x9f   :  { %v542_v24 = vsel %vm541_vm5, %v637_v15, %v538_v20 }
  0xa0   :  { %520 = vmatpush.bf16.msra.mxu0 %v503_v6  ;;  %v547_v26 = vsel %vm544_vm2, %v546_v22, %v542_v24 }
  0xa1   :  { %v551_v28 = vmul.f32 %v550_v27, %v547_v26 }
  0xa3   :  { %622 = vmatmul.msk.bf16.vlgmr.msra.gmra.mxu0 %vm621_vm6, %v744_v8  ;;  %v556_v31 = vmul.f32 %v551_v28, %v1220_v36  ;;  %v564_v34 = vrot.slane %v551_v28, 4 }
  0xa5   :  { %v557_v32 = vsub.f32 %v555_v30, %v556_v31  ;;  %v565_v37 = vadd.f32 %v564_v34, %v551_v28 }
  0xa7   :  { %v558_v33 = vrot.slane %v557_v32, 4  ;;  %v566_v39 = vrot.slane %v565_v37, 2 }
  0xa9   :  { %v559_v35 = vadd.f32 %v558_v33, %v557_v32  ;;  %v567_v41 = vadd.f32 %v566_v39, %v565_v37 }
  0xab   :  { %v560_v38 = vrot.slane %v559_v35, 2  ;;  %v568_v43 = vrot.slane %v567_v41, 1 }
  0xad   :  { %v561_v40 = vadd.f32 %v560_v38, %v559_v35  ;;  %v569_v45 = vadd.f32 %v568_v43, %v567_v41 }
  0xaf   :  { %v562_v42 = vrot.slane %v561_v40, 1 }
  0xb1   :  { %v563_v44 = vadd.f32 %v562_v42, %v561_v40 }
  0xb3   :  { %v571_v46 = vsel %vm570_vm4, %v563_v44, %v569_v45 }
  0xb4   :  { %572 = vst [vmem:[#allocation8] sm:$0x3] %v571_v46 }
 0x120   :  { %v522_v47 = vpop.f32.mrf.mxu0 }
 0x121   :  { %vm623_vm1 = vcmp.lt.s32.totalorder %v522_v47, 0  ;;  %v624_v48 = vceil.f32 %v522_v47  ;;  %v625_v36 = vfloor.f32 %v522_v47 }
 0x123   :  { %v626_v49 = vsel %vm623_vm1, %v624_v48, %v625_v36 }
 0x124   :  { %v627_v50 = vcvt.f32.s32 %v626_v49 }
 0x126   :  { %528 = vst.msk [vmem:[#allocation6] sm:$0xff] %vm527_vm13, %v627_v50 }
 0x127   :  { %594 = dma.vmem_to_hbm [thread:$0]  %s590_s21, 128, %s592_s24, [#allocation7]  }
 0x128   :  { %v524_v51 = vpop.f32.mrf.mxu0  ;;  %605 = dma.vmem_to_hbm [thread:$0]  %s601_s26, 32, %s603_s29, [#allocation7]  }
 0x129   :  { %738 = dma.done.wait [#allocation4], 128  }
 0x12a   :  { %739 = vsyncadd [#allocation4], 4294967168 }
 0x12b   :  { %740 = dma.done.wait [#allocation7], 160  }
 0x12c   :  { %741 = vsyncadd [#allocation7], 4294967136 }
 0x12d   :  { %618 = vsyncpa [#allocation3], 1 }
 0x12e   :  { %619 = vsyncpa [#allocation4], 1 }
 0x12f   :  { %620 = vsyncpa [#allocation7], 1 }

</bundles_post_ra>
